<compile_context>
chip_gen: v5e
topology: v5e:2x2
jax: 0.10.0
libtpu: 0.0.40
codegen_flags: <defaults>
</compile_context>

<pallas_src>
import functools

import jax
import jax.numpy as jnp
from jax import lax
from jax.experimental import pallas as pl
from jax.experimental.pallas import tpu as pltpu


# ---------------------------------------------------------------------------
# Fused kernel: one grid step == one batch element
# ---------------------------------------------------------------------------
def _fused_attention_kernel(x_ref, wqkv_ref, wout_ref, bout_ref, o_ref,
                            *, heads, scale):
    N = x_ref.shape[1]
    inner = wout_ref.shape[0]
    d_head = inner // heads

    x = x_ref[0]                                                     # (N, D)

    # ---- qkv projection (no bias), f32 accumulation on the MXU -----------
    qkv = jnp.dot(x, wqkv_ref[...],
                  preferred_element_type=jnp.float32)                # (N, 3*inner)

    # ---- per-head scaled-dot-product attention (heads static -> unrolled) -
    head_outs = []
    for h in range(heads):
        # chunk(3, -1) then 'b n (h d) -> b h n d' == static lane slices
        q = qkv[:, h * d_head:(h + 1) * d_head] * scale              # fold scale into q
        k = qkv[:, inner + h * d_head: inner + (h + 1) * d_head]
        v = qkv[:, 2 * inner + h * d_head: 2 * inner + (h + 1) * d_head]

        # q @ k^T without an explicit transpose: contract last dims directly.
        s = lax.dot_general(q, k, (((1,), (1,)), ((), ())),
                            preferred_element_type=jnp.float32)      # (N, N)

        m = jnp.max(s, axis=-1, keepdims=True)
        p = jnp.exp(s - m)
        denom = jnp.sum(p, axis=-1, keepdims=True)

        # Normalize AFTER attn @ v: scales (N, d_head) instead of (N, N);
        # approx reciprocal runs on the (otherwise idle) EUP slot.
        o_h = jnp.dot(p, v, preferred_element_type=jnp.float32)      # (N, d_head)
        o_h = o_h * pl.reciprocal(denom, approx=True)
        head_outs.append(o_h)

    # 'b h n d -> b n (h d)': concat gives the lane-dense (N, inner) slab.
    o = jnp.concatenate(head_outs, axis=-1)                          # (N, inner)

    # ---- output projection + bias (Dropout(p=0.0) is identity) -----------
    out = jnp.dot(o.astype(wout_ref.dtype), wout_ref[...],
                  preferred_element_type=jnp.float32)
    out = out + bout_ref[...].astype(jnp.float32)                    # (N, D)
    o_ref[0] = out.astype(o_ref.dtype)


# ---------------------------------------------------------------------------
# Wrapper: single fused pallas_call, grid over batch
# ---------------------------------------------------------------------------
def attention_forward(x, w_qkv, w_out, b_out, heads):
    B, N, D = x.shape
    inner3 = w_qkv.shape[1]
    inner = inner3 // 3
    assert w_out.shape == (inner, D)
    assert b_out.shape == (1, D)
    scale = float(D) ** (-0.5)          # module uses `dim`, not dim_head

    kernel = functools.partial(_fused_attention_kernel, heads=heads, scale=scale)
    return pl.pallas_call(
        kernel,
        out_shape=jax.ShapeDtypeStruct((B, N, D), x.dtype),
        grid=(B,),
        in_specs=[
            pl.BlockSpec((1, N, D), lambda b: (b, 0, 0)),        # x: one batch/step
            pl.BlockSpec((D, inner3), lambda b: (0, 0)),         # W_qkv (resident)
            pl.BlockSpec((inner, D), lambda b: (0, 0)),          # W_out (resident)
            pl.BlockSpec((1, D), lambda b: (0, 0)),              # bias  (resident)
        ],
        out_specs=pl.BlockSpec((1, N, D), lambda b: (b, 0, 0)),
        compiler_params=pltpu.CompilerParams(
            dimension_semantics=("parallel",)),
    )(x, w_qkv, w_out, b_out)


# ---------------------------------------------------------------------------
# Pure-JAX reference for correctness check
# ---------------------------------------------------------------------------
def attention_ref(x, w_qkv, w_out, b_out, heads):
    B, N, D = x.shape
    inner = w_qkv.shape[1] // 3
    d_head = inner // heads
    scale = float(D) ** (-0.5)
    qkv = x @ w_qkv
    qkv = qkv.reshape(B, N, 3, heads, d_head)
    q, k, v = (qkv[:, :, i].transpose(0, 2, 1, 3) for i in range(3))
    dots = jnp.einsum("bhid,bhjd->bhij", q, k) * scale
    attn = jax.nn.softmax(dots, axis=-1)
    o = jnp.einsum("bhij,bhjd->bhid", attn, v)
    o = o.transpose(0, 2, 1, 3).reshape(B, N, inner)
    return o @ w_out + b_out[0]


if __name__ == "__main__":
    # small shapes consistent with the module
    B, N, DIM = 2, 8, 32
    HEADS, DIM_HEAD = 4, 16
    INNER = HEADS * DIM_HEAD

    key = jax.random.PRNGKey(0)
    k_x, k_qkv, k_out, k_b = jax.random.split(key, 4)

    x = jax.random.normal(k_x, (B, N, DIM), dtype=jnp.float32)
    # deterministic parameter init (synthetic, not a checkpoint)
    w_qkv = jax.random.normal(k_qkv, (DIM, 3 * INNER), dtype=jnp.float32) * 0.05
    w_out = jax.random.normal(k_out, (INNER, DIM), dtype=jnp.float32) * 0.05
    b_out = jax.random.normal(k_b, (1, DIM), dtype=jnp.float32) * 0.05

    out = attention_forward(x, w_qkv, w_out, b_out, HEADS)
    out = jax.block_until_ready(out)

    ref = attention_ref(x, w_qkv, w_out, b_out, HEADS)
    assert out.shape == (B, N, DIM)
    # slightly relaxed tolerance: approx reciprocal (EUP vrcp) in the softmax
    assert jnp.allclose(out, ref, atol=2e-3, rtol=2e-3), "mismatch vs reference"

    print("KERNEL_OK")
</pallas_src>

<mosaic_0001>
module attributes {stable_mosaic.version = 11 : i64} {
  func.func @_fused_attention_kernel(%arg0: i32, %arg1: memref<1x8x32xf32, #tpu.memory_space<vmem>>, %arg2: memref<32x192xf32, #tpu.memory_space<vmem>>, %arg3: memref<64x32xf32, #tpu.memory_space<vmem>>, %arg4: memref<1x32xf32, #tpu.memory_space<vmem>>, %arg5: memref<1x8x32xf32, #tpu.memory_space<vmem>>) attributes {dimension_semantics = [#tpu.dimension_semantics<parallel>], iteration_bounds = array<i64: 2>, scalar_prefetch = 0 : i64, scratch_operands = 0 : i64, tpu.core_type = #tpu.core_type<tc>, window_params = [{transform_indices = @transform_0, window_bounds = array<i64: 1, 8, 32>}, {pipeline_mode = #tpu.pipeline_mode<synchronous>, transform_indices = @transform_1, window_bounds = array<i64: 32, 192>}, {pipeline_mode = #tpu.pipeline_mode<synchronous>, transform_indices = @transform_2, window_bounds = array<i64: 64, 32>}, {pipeline_mode = #tpu.pipeline_mode<synchronous>, transform_indices = @transform_3, window_bounds = array<i64: 1, 32>}, {transform_indices = @transform_4, window_bounds = array<i64: 1, 8, 32>}]} {
    %c0 = arith.constant 0 : index
    %c0_0 = arith.constant 0 : index
    %c0_1 = arith.constant 0 : index
    %0 = vector.load %arg1[%c0, %c0_0, %c0_1] : memref<1x8x32xf32, #tpu.memory_space<vmem>>, vector<1x8x32xf32>
    %1 = vector.shape_cast %0 : vector<1x8x32xf32> to vector<8x32xf32>
    %c0_2 = arith.constant 0 : index
    %c0_3 = arith.constant 0 : index
    %2 = vector.load %arg2[%c0_2, %c0_3] : memref<32x192xf32, #tpu.memory_space<vmem>>, vector<32x192xf32>
    %cst = arith.constant dense<0.000000e+00> : vector<8x192xf32>
    %3 = tpu.matmul %1, %2, %cst {dimension_numbers = #tpu.dot_dimension_numbers<[1], [0], [0], [1], [0, 0, 1, 1], [], []>} : vector<8x32xf32>, vector<32x192xf32>, vector<8x192xf32> -> vector<8x192xf32>
    %4 = vector.extract_strided_slice %3 {offsets = [0, 0], sizes = [8, 16], strides = [1, 1]} : vector<8x192xf32> to vector<8x16xf32>
    %cst_4 = arith.constant 0.176776692 : f32
    %5 = vector.broadcast %cst_4 : f32 to vector<8x16xf32>
    %6 = arith.mulf %4, %5 : vector<8x16xf32>
    %7 = vector.extract_strided_slice %3 {offsets = [0, 64], sizes = [8, 16], strides = [1, 1]} : vector<8x192xf32> to vector<8x16xf32>
    %8 = vector.extract_strided_slice %3 {offsets = [0, 128], sizes = [8, 16], strides = [1, 1]} : vector<8x192xf32> to vector<8x16xf32>
    %cst_5 = arith.constant dense<0.000000e+00> : vector<8x8xf32>
    %9 = tpu.matmul %6, %7, %cst_5 {dimension_numbers = #tpu.dot_dimension_numbers<[1], [1], [0], [0], [0, 0, 1, 0], [], []>} : vector<8x16xf32>, vector<8x16xf32>, vector<8x8xf32> -> vector<8x8xf32>
    %cst_6 = arith.constant dense<0xFF800000> : vector<8xf32>
    %10 = vector.multi_reduction <maximumf>, %9, %cst_6 [1] : vector<8x8xf32> to vector<8xf32>
    %11 = vector.shape_cast %10 : vector<8xf32> to vector<8x1xf32>
    %12 = vector.broadcast %11 : vector<8x1xf32> to vector<8x8xf32>
    %13 = arith.subf %9, %12 : vector<8x8xf32>
    %14 = math.exp %13 : vector<8x8xf32>
    %cst_7 = arith.constant dense<0.000000e+00> : vector<8xf32>
    %15 = vector.multi_reduction <add>, %14, %cst_7 [1] : vector<8x8xf32> to vector<8xf32>
    %16 = vector.shape_cast %15 : vector<8xf32> to vector<8x1xf32>
    %cst_8 = arith.constant dense<0.000000e+00> : vector<8x16xf32>
    %17 = tpu.matmul %14, %8, %cst_8 {dimension_numbers = #tpu.dot_dimension_numbers<[1], [0], [0], [1], [0, 0, 1, 1], [], []>} : vector<8x8xf32>, vector<8x16xf32>, vector<8x16xf32> -> vector<8x16xf32>
    %18 = tpu.reciprocal %16 {approx = true} : vector<8x1xf32> -> vector<8x1xf32>
    %19 = vector.broadcast %18 : vector<8x1xf32> to vector<8x16xf32>
    %20 = arith.mulf %17, %19 : vector<8x16xf32>
    %21 = vector.extract_strided_slice %3 {offsets = [0, 16], sizes = [8, 16], strides = [1, 1]} : vector<8x192xf32> to vector<8x16xf32>
    %cst_9 = arith.constant 0.176776692 : f32
    %22 = vector.broadcast %cst_9 : f32 to vector<8x16xf32>
    %23 = arith.mulf %21, %22 : vector<8x16xf32>
    %24 = vector.extract_strided_slice %3 {offsets = [0, 80], sizes = [8, 16], strides = [1, 1]} : vector<8x192xf32> to vector<8x16xf32>
    %25 = vector.extract_strided_slice %3 {offsets = [0, 144], sizes = [8, 16], strides = [1, 1]} : vector<8x192xf32> to vector<8x16xf32>
    %cst_10 = arith.constant dense<0.000000e+00> : vector<8x8xf32>
    %26 = tpu.matmul %23, %24, %cst_10 {dimension_numbers = #tpu.dot_dimension_numbers<[1], [1], [0], [0], [0, 0, 1, 0], [], []>} : vector<8x16xf32>, vector<8x16xf32>, vector<8x8xf32> -> vector<8x8xf32>
    %cst_11 = arith.constant dense<0xFF800000> : vector<8xf32>
    %27 = vector.multi_reduction <maximumf>, %26, %cst_11 [1] : vector<8x8xf32> to vector<8xf32>
    %28 = vector.shape_cast %27 : vector<8xf32> to vector<8x1xf32>
    %29 = vector.broadcast %28 : vector<8x1xf32> to vector<8x8xf32>
    %30 = arith.subf %26, %29 : vector<8x8xf32>
    %31 = math.exp %30 : vector<8x8xf32>
    %cst_12 = arith.constant dense<0.000000e+00> : vector<8xf32>
    %32 = vector.multi_reduction <add>, %31, %cst_12 [1] : vector<8x8xf32> to vector<8xf32>
    %33 = vector.shape_cast %32 : vector<8xf32> to vector<8x1xf32>
    %cst_13 = arith.constant dense<0.000000e+00> : vector<8x16xf32>
    %34 = tpu.matmul %31, %25, %cst_13 {dimension_numbers = #tpu.dot_dimension_numbers<[1], [0], [0], [1], [0, 0, 1, 1], [], []>} : vector<8x8xf32>, vector<8x16xf32>, vector<8x16xf32> -> vector<8x16xf32>
    %35 = tpu.reciprocal %33 {approx = true} : vector<8x1xf32> -> vector<8x1xf32>
    %36 = vector.broadcast %35 : vector<8x1xf32> to vector<8x16xf32>
    %37 = arith.mulf %34, %36 : vector<8x16xf32>
    %38 = vector.extract_strided_slice %3 {offsets = [0, 32], sizes = [8, 16], strides = [1, 1]} : vector<8x192xf32> to vector<8x16xf32>
    %cst_14 = arith.constant 0.176776692 : f32
    %39 = vector.broadcast %cst_14 : f32 to vector<8x16xf32>
    %40 = arith.mulf %38, %39 : vector<8x16xf32>
    %41 = vector.extract_strided_slice %3 {offsets = [0, 96], sizes = [8, 16], strides = [1, 1]} : vector<8x192xf32> to vector<8x16xf32>
    %42 = vector.extract_strided_slice %3 {offsets = [0, 160], sizes = [8, 16], strides = [1, 1]} : vector<8x192xf32> to vector<8x16xf32>
    %cst_15 = arith.constant dense<0.000000e+00> : vector<8x8xf32>
    %43 = tpu.matmul %40, %41, %cst_15 {dimension_numbers = #tpu.dot_dimension_numbers<[1], [1], [0], [0], [0, 0, 1, 0], [], []>} : vector<8x16xf32>, vector<8x16xf32>, vector<8x8xf32> -> vector<8x8xf32>
    %cst_16 = arith.constant dense<0xFF800000> : vector<8xf32>
    %44 = vector.multi_reduction <maximumf>, %43, %cst_16 [1] : vector<8x8xf32> to vector<8xf32>
    %45 = vector.shape_cast %44 : vector<8xf32> to vector<8x1xf32>
    %46 = vector.broadcast %45 : vector<8x1xf32> to vector<8x8xf32>
    %47 = arith.subf %43, %46 : vector<8x8xf32>
    %48 = math.exp %47 : vector<8x8xf32>
    %cst_17 = arith.constant dense<0.000000e+00> : vector<8xf32>
    %49 = vector.multi_reduction <add>, %48, %cst_17 [1] : vector<8x8xf32> to vector<8xf32>
    %50 = vector.shape_cast %49 : vector<8xf32> to vector<8x1xf32>
    %cst_18 = arith.constant dense<0.000000e+00> : vector<8x16xf32>
    %51 = tpu.matmul %48, %42, %cst_18 {dimension_numbers = #tpu.dot_dimension_numbers<[1], [0], [0], [1], [0, 0, 1, 1], [], []>} : vector<8x8xf32>, vector<8x16xf32>, vector<8x16xf32> -> vector<8x16xf32>
    %52 = tpu.reciprocal %50 {approx = true} : vector<8x1xf32> -> vector<8x1xf32>
    %53 = vector.broadcast %52 : vector<8x1xf32> to vector<8x16xf32>
    %54 = arith.mulf %51, %53 : vector<8x16xf32>
    %55 = vector.extract_strided_slice %3 {offsets = [0, 48], sizes = [8, 16], strides = [1, 1]} : vector<8x192xf32> to vector<8x16xf32>
    %cst_19 = arith.constant 0.176776692 : f32
    %56 = vector.broadcast %cst_19 : f32 to vector<8x16xf32>
    %57 = arith.mulf %55, %56 : vector<8x16xf32>
    %58 = vector.extract_strided_slice %3 {offsets = [0, 112], sizes = [8, 16], strides = [1, 1]} : vector<8x192xf32> to vector<8x16xf32>
    %59 = vector.extract_strided_slice %3 {offsets = [0, 176], sizes = [8, 16], strides = [1, 1]} : vector<8x192xf32> to vector<8x16xf32>
    %cst_20 = arith.constant dense<0.000000e+00> : vector<8x8xf32>
    %60 = tpu.matmul %57, %58, %cst_20 {dimension_numbers = #tpu.dot_dimension_numbers<[1], [1], [0], [0], [0, 0, 1, 0], [], []>} : vector<8x16xf32>, vector<8x16xf32>, vector<8x8xf32> -> vector<8x8xf32>
    %cst_21 = arith.constant dense<0xFF800000> : vector<8xf32>
    %61 = vector.multi_reduction <maximumf>, %60, %cst_21 [1] : vector<8x8xf32> to vector<8xf32>
    %62 = vector.shape_cast %61 : vector<8xf32> to vector<8x1xf32>
    %63 = vector.broadcast %62 : vector<8x1xf32> to vector<8x8xf32>
    %64 = arith.subf %60, %63 : vector<8x8xf32>
    %65 = math.exp %64 : vector<8x8xf32>
    %cst_22 = arith.constant dense<0.000000e+00> : vector<8xf32>
    %66 = vector.multi_reduction <add>, %65, %cst_22 [1] : vector<8x8xf32> to vector<8xf32>
    %67 = vector.shape_cast %66 : vector<8xf32> to vector<8x1xf32>
    %cst_23 = arith.constant dense<0.000000e+00> : vector<8x16xf32>
    %68 = tpu.matmul %65, %59, %cst_23 {dimension_numbers = #tpu.dot_dimension_numbers<[1], [0], [0], [1], [0, 0, 1, 1], [], []>} : vector<8x8xf32>, vector<8x16xf32>, vector<8x16xf32> -> vector<8x16xf32>
    %69 = tpu.reciprocal %67 {approx = true} : vector<8x1xf32> -> vector<8x1xf32>
    %70 = vector.broadcast %69 : vector<8x1xf32> to vector<8x16xf32>
    %71 = arith.mulf %68, %70 : vector<8x16xf32>
    %72 = tpu.concatenate %20, %37, %54, %71 in 1 : vector<8x16xf32>, vector<8x16xf32>, vector<8x16xf32>, vector<8x16xf32> -> vector<8x64xf32>
    %c0_24 = arith.constant 0 : index
    %c0_25 = arith.constant 0 : index
    %73 = vector.load %arg3[%c0_24, %c0_25] : memref<64x32xf32, #tpu.memory_space<vmem>>, vector<64x32xf32>
    %cst_26 = arith.constant dense<0.000000e+00> : vector<8x32xf32>
    %74 = tpu.matmul %72, %73, %cst_26 {dimension_numbers = #tpu.dot_dimension_numbers<[1], [0], [0], [1], [0, 0, 1, 1], [], []>} : vector<8x64xf32>, vector<64x32xf32>, vector<8x32xf32> -> vector<8x32xf32>
    %c0_27 = arith.constant 0 : index
    %c0_28 = arith.constant 0 : index
    %75 = vector.load %arg4[%c0_27, %c0_28] : memref<1x32xf32, #tpu.memory_space<vmem>>, vector<1x32xf32>
    %76 = vector.broadcast %75 : vector<1x32xf32> to vector<8x32xf32>
    %77 = arith.addf %74, %76 : vector<8x32xf32>
    %c0_29 = arith.constant 0 : index
    %c0_30 = arith.constant 0 : index
    %c0_31 = arith.constant 0 : index
    %78 = vector.load %arg5[%c0_29, %c0_30, %c0_31] : memref<1x8x32xf32, #tpu.memory_space<vmem>>, vector<1x8x32xf32>
    %79 = vector.shape_cast %78 : vector<1x8x32xf32> to vector<8x32xf32>
    %80 = vector.shape_cast %77 : vector<8x32xf32> to vector<1x8x32xf32>
    tpu.vector_store %arg5[%c0_29, %c0_30, %c0_31], %80 {strides = array<i32>} : memref<1x8x32xf32, #tpu.memory_space<vmem>>, vector<1x8x32xf32>,
    return
  }
  func.func @transform_0(%arg0: i32) -> (i32, i32, i32) {
    %c0_i32 = arith.constant 0 : i32
    %c0_i32_0 = arith.constant 0 : i32
    %c0_i32_1 = arith.constant 0 : i32
    return %arg0, %c0_i32, %c0_i32_0 : i32, i32, i32
  }
  func.func @transform_1(%arg0: i32) -> (i32, i32) {
    %c0_i32 = arith.constant 0 : i32
    %c0_i32_0 = arith.constant 0 : i32
    %c0_i32_1 = arith.constant 0 : i32
    return %c0_i32, %c0_i32_0 : i32, i32
  }
  func.func @transform_2(%arg0: i32) -> (i32, i32) {
    %c0_i32 = arith.constant 0 : i32
    %c0_i32_0 = arith.constant 0 : i32
    %c0_i32_1 = arith.constant 0 : i32
    return %c0_i32, %c0_i32_0 : i32, i32
  }
  func.func @transform_3(%arg0: i32) -> (i32, i32) {
    %c0_i32 = arith.constant 0 : i32
    %c0_i32_0 = arith.constant 0 : i32
    %c0_i32_1 = arith.constant 0 : i32
    return %c0_i32, %c0_i32_0 : i32, i32
  }
  func.func @transform_4(%arg0: i32) -> (i32, i32, i32) {
    %c0_i32 = arith.constant 0 : i32
    %c0_i32_0 = arith.constant 0 : i32
    %c0_i32_1 = arith.constant 0 : i32
    return %arg0, %c0_i32, %c0_i32_0 : i32, i32, i32
  }
}

</mosaic_0001>

<bundles_post_ra>
// kernel: tpu_custom_call.1
= control target key start
LH: loop header
LB: loop body
LE: loop exit
PB: predicated region body
PF: predicated region fallthrough
CT: control target
= control target key end

     0   :  { %9 = vsyncpa [#allocation3], 0  ;;  %s991_s0 = inlined_call_operand.vmem [shape: f32[2,8,32], index: 0, kind: input, shape index: {}]   ;;  %s992_s1 = inlined_call_operand.vmem [shape: f32[32,192], index: 1, kind: input, shape index: {}]   ;;  %s993_s2 = inlined_call_operand.vmem [shape: f32[64,32], index: 2, kind: input, shape index: {}]   ;;  %s994_s3 = inlined_call_operand.vmem [shape: f32[1,32], index: 3, kind: input, shape index: {}]   ;;  %s995_s4 = inlined_call_operand.hbm [shape: f32[2,8,32], index: 4, kind: output, shape index: {}]  }
   0x1   :  { %11 = vsyncpa [#allocation3 + $0x1], 0  ;;  %s819_s15 = smov 0   ;;  %s821_s16 = smov 0  }
   0x2   :  { %s823_s17 = smov 0   ;;  %s825_s18 = smov 0  }
   0x3 LB: > { %s840_s19 = sadd.s32 4294967295, %s785_s18   ;;  %s635_s20 = sadd.s32 4294967294, %s785_s18   ;;  %s785_s18 = sphi %s825_s18, %s1001_s18   ;;  %s781_s17 = sphi %s823_s17, %s1000_s17   ;;  %s777_s16 = sphi %s821_s16, %s999_s16   ;;  %s773_s15 = sphi %s819_s15, %s998_s15  }
   0x4   : > { %s844_s21 = sadd.s32 1, %s785_s18   ;;  %s113_s22 = sadd.s32 1, %s781_s17 }
   0x5   : > { %s110_s23 = ssub.s32 %s785_s18, %s844_s21  ;;  %p123_p0 = scmp.ne.s32.totalorder %s781_s17, %s777_s16 }
   0x6   : > { %p111_p1 = scmp.eq.s32.totalorder %s110_s23, 0  ;;  %p124_p2 = scmp.eq.s32.totalorder %s840_s19, 1 }
   0x7   : > { %p129_p3 = scmp.ne.s32.totalorder %s777_s16, %s773_s15  ;;  %p130_p4 = scmp.eq.s32.totalorder %s635_s20, 1 }
   0x8   : > { %s855_s24 = scalar_select %p111_p1, %s781_s17, %s113_s22  }
   0x9   : > { %p857_p5 = por %p124_p2, %p123_p0  ;;  %p861_p6 = por %p130_p4, %p129_p3 }
   0xa   : > { %p638_p7 = scmp.ge.s32.totalorder %s785_s18, 1  ;;  %p164_p8 = scmp.lt.s32.totalorder %s785_s18, 3 }
   0xc   : > { %p165_p9 = pnand %p638_p7, %p164_p8 }
   0xd   : > { %p189_p10 = scmp.lt.s32.totalorder (!%p165_p9), %s840_s19, 1  ;;  %s787_s5 = smov (!%p165_p9), 16  }
   0xe   : > { %168 = sbr.rel (%p165_p9) target bundleno = 1195 (0x4ab), region = 36  ;;  %s788_s6 = smov (!%p165_p9), 48  }
   0xf   : > { %s790_s8 = smov (!%p165_p9), 80   ;;  %s791_s9 = smov (!%p165_p9), 112  }
  0x10   : > { %s793_s11 = smov (!%p165_p9), 32  }
  0x13   : > { %v200_v0 = vld [vmem:[%s992_s1 + $0x30] sm:$0xff]  ;;  %v198_v1 = vld [vmem:[%s992_s1 + $0x20] sm:$0xff]  ;;  %s190_s7 = scalar_select %p189_p10, %s840_s19, 1  ;;  %vm202_vm0 = vcmask 261120   ;;  %v201_v5 = vld [vmem:[%s992_s1 + $0x38] sm:$0xff]  ;;  %vm250_vm1 = vcmask 130048  }
  0x14   : > { %218 = vmatpush.msra.mxu1 %v200_v0  ;;  %v196_v2 = vld [vmem:[%s992_s1 + $0x10] sm:$0xff]  ;;  %v194_v3 = vld [vmem:[%s992_s1] sm:$0xff]  ;;  %v199_v6 = vld [vmem:[%s992_s1 + $0x28] sm:$0xff]  ;;  %vm276_vm2 = vcmask 64512   ;;  %vm521_vm3 = vcmask 392192   ;;  %vm535_vm4 = vcmask 523264  }
  0x15   : > { %s640_s10 = sshll.u32 %s190_s7, 3  ;;  %v197_v7 = vld [vmem:[%s992_s1 + $0x18] sm:$0xff]  ;;  %v195_v8 = vld [vmem:[%s992_s1 + $0x8] sm:$0xff]  ;;  %s789_s7 = smov 64   ;;  %v529_v0 = vld [vmem:[%s993_s2 + $0x30] sm:$0xff] }
  0x16   : > { %219 = vmatpush.msra.mxu1 %v198_v1  ;;  %s192_s13 = scalar_lea.vmem %s991_s0, %s640_s10  ;;  %s792_s10 = smov 96   ;;  %v530_v63 = vld [vmem:[%s993_s2 + $0x38] sm:$0xff]  ;;  %v528_v1 = vld [vmem:[%s993_s2 + $0x28] sm:$0xff] }
  0x17   : > { %v193_v4 = vld [vmem:[%s192_s13] sm:$0xff]  ;;  %s657_s13 = sshll.u32 %s840_s19, 3 }
  0x18   : > { %220 = vmatpush.msra.mxu1 %v196_v2  ;;  %v527_v2 = vld [vmem:[%s993_s2 + $0x20] sm:$0xff]  ;;  %s571_s22 = scalar_lea.hbm %s995_s4, %s657_s13 }
  0x19   : > { %s575_s30 = sshll.u32 %s571_s22, 4  ;;  %s576_s30 = int_to_ptr.hbm [resolvable:$true] %s575_s30 }
  0x1a   : > { %221 = vmatpush.msra.mxu1 %v194_v3  ;;  %v526_v3 = vld [vmem:[%s993_s2 + $0x18] sm:$0xff]  ;;  %s737_s19 = sshra.s32 %s576_s30, 4  ;;  %s738_s19 = int_to_ptr.hbm [resolvable:$true] %s737_s19 }
  0x1b   : > { %641 = vmatmul.msk.f32.vlgmr.msra.gmra.mxu1 %vm202_vm0, %v193_v4  ;;  %p744_p0 = scmp.lt.s32.totalorder %s738_s19, %s995_s4 }
  0x1c   : > { %238 = vmatpush.msrb.mxu1 %v201_v5  ;;  %v524_v5 = vld [vmem:[%s993_s2 + $0x8] sm:$0xff] }
  0x1e   : > { %239 = vmatpush.msrb.mxu1 %v199_v6  ;;  %v523_v6 = vld [vmem:[%s993_s2] sm:$0xff] }
  0x20   : > { %240 = vmatpush.msrb.mxu1 %v197_v7 }
  0x22   : > { %241 = vmatpush.msrb.mxu1 %v195_v8 }
  0x23   : > { %642 = vmatmul.msk.f32.vlgmr.msrb.gmra.mxu1 %vm202_vm0, %v193_v4  ;;  %v525_v4 = vld [vmem:[%s993_s2 + $0x10] sm:$0xff] }
  0x98   : > { %v223_v9 = vpop.f32.mrf.mxu1 }
  0x99   : > { %444 = vrot.lane.b32.xlu2 %v223_v9, %s787_s5  ;;  %313 = vrot.lane.b32.xlu1 %v223_v9, %s788_s6  ;;  %v246_v10 = vmul.f32 0.17677669, %v223_v9 }
  0x9a   : > { %248 = vrot.lane.b32.xlu0 %v223_v9, %s789_s7 }
  0xa0   : > { %v243_v11 = vpop.f32.mrf.mxu1 }
  0xa1   : > { %442 = vrot.lane.b32.xlu2 %v246_v10, %s790_s8  ;;  %311 = vrot.lane.b32.xlu1 %v246_v10, %s791_s9 }
  0xa2   : > { %304 = vmatpush.msra.mxu3 %v243_v11 }
  0xa9   : > { %377 = vrot.lane.b32.xlu2 %v246_v10, %s792_s10  ;;  %379 = vrot.lane.b32.xlu1 %v223_v9, %s793_s11 }
  0xf3   : > { %v445_v12 = vpop.permute.xlu2 %444 }
  0xfb   : > { %v443_v16 = vpop.permute.xlu2 %442 }
 0x103   : > { %v378_v18 = vpop.permute.xlu2 %377 }
 0x10b   : > { %v314_v13 = vpop.permute.xlu1 %313 }
 0x10c   : > { %v249_v14 = vpop.permute.xlu0 %248  ;;  %646 = vmatpush.xpose.msk.msrb.mxu3 %vm250_vm1, %v314_v13 }
 0x10d   : > { %643 = vmatpush.xpose.msk.msra.mxu2 %vm250_vm1, %v249_v14 }
 0x110   : > { %644 = vmatmul.msk.f32.vlgmr.msra.gmra.mxu2 %vm250_vm1, %v246_v10 }
 0x113   : > { %v312_v15 = vpop.permute.xlu1 %311 }
 0x11b   : > { %v380_v17 = vpop.permute.xlu1 %379 }
 0x11c   : > { %649 = vmatpush.xpose.msk.msra.mxu0 %vm250_vm1, %v380_v17 }
 0x11f   : > { %650 = vmatmul.msk.f32.vlgmr.msra.gmra.mxu0 %vm250_vm1, %v378_v18 }
 0x120   : > { %547 = vmatpush.msrb.mxu0 %v530_v63 }
 0x122   : > { %548 = vmatpush.msrb.mxu0 %v529_v0 }
 0x124   : > { %549 = vmatpush.msrb.mxu0 %v528_v1 }
 0x126   : > { %550 = vmatpush.msrb.mxu0 %v527_v2 }
 0x128   : > { %551 = vmatpush.msrb.mxu0 %v526_v3 }
 0x12a   : > { %552 = vmatpush.msrb.mxu0 %v525_v4 }
 0x12c   : > { %553 = vmatpush.msrb.mxu0 %v524_v5 }
 0x12e   : > { %554 = vmatpush.msrb.mxu0 %v523_v6 }
 0x193   : > { %v273_v19 = vpop.f32.mrf.mxu2 }
 0x194   : > { %v277_v20 = vsel %vm276_vm2, %v273_v19, -inf }
 0x195   : > { %278 = vmax.xlane.f32.xlu0 %v277_v20 }
 0x19c   : > { %v402_v32 = vpop.f32.mrf.mxu0 }
 0x19d   : > { %v405_v33 = vsel %vm276_vm2, %v402_v32, -inf }
 0x1a9   : > { %349 = vrot.lane.b32.xlu0 %v243_v11, %s791_s9  ;;  %s743_s9 = scalar_lea.hbm %s995_s4, 16 }
 0x1b1   : > { %414 = vrot.lane.b32.xlu0 %v243_v11, %s792_s10 }
 0x208   : > { %v279_v21 = vpop.xlane.xlu0 %278 }
 0x209   : > { %v280_v22 = vsub.f32 %v273_v19, %v279_v21 }
 0x20b   : > { %v281_v23 = vmul.f32 1.442695, %v280_v22 }
 0x20d   : > { %707 = vpow2.f32 %v281_v23 }
 0x213   : > { %v708_v24 = vpop.eup %707 }
 0x214   : > { %645 = vmatmul.msk.f32.vlgmr.msra.gmra.mxu3 %vm276_vm2, %v708_v24  ;;  %v283_v50 = vsel %vm276_vm2, %v708_v24, 0.0 }
 0x215   : > { %652 = vmatpush.xpose.msk.msra.mxu3 %vm250_vm1, %v445_v12 }
 0x21b   : > { %v350_v25 = vpop.permute.xlu0 %349 }
 0x21c   : > { %647 = vmatmul.msk.f32.vlgmr.msrb.gmra.mxu3 %vm250_vm1, %v312_v15  ;;  %370 = vmatpush.msrb.mxu2 %v350_v25 }
 0x223   : > { %v415_v26 = vpop.permute.xlu0 %414 }
 0x224   : > { %653 = vmatmul.msk.f32.vlgmr.msra.gmra.mxu3 %vm250_vm1, %v443_v16  ;;  %435 = vmatpush.msra.mxu1 %v415_v26  ;;  %v706_v16 = vld [vmem:[%s994_s3] ss:$0 sm:$0xff] }
 0x297   : > { %v912_v27 = vpop.f32.mrf.mxu3 }
 0x29f   : > { %v336_v28 = vpop.f32.mrf.mxu3 }
 0x2a0   : > { %v339_v29 = vsel %vm276_vm2, %v336_v28, -inf }
 0x2a1   : > { %340 = vmax.xlane.f32.xlu1 %v339_v29 }
 0x2a7   : > { %v467_v30 = vpop.f32.mrf.mxu3 }
 0x2a8   : > { %v470_v31 = vsel %vm276_vm2, %v467_v30, -inf }
 0x2a9   : > { %471 = vmax.xlane.f32.xlu2 %v470_v31 }
 0x2b1   : > { %406 = vmax.xlane.f32.xlu2 %v405_v33 }
 0x2ba   : > { %479 = vrot.lane.b32.xlu1 %v243_v11, %s790_s8 }
 0x314   : > { %v341_v34 = vpop.xlane.xlu1 %340 }
 0x315   : > { %v342_v35 = vsub.f32 %v336_v28, %v341_v34 }
 0x317   : > { %v343_v36 = vmul.f32 1.442695, %v342_v35 }
 0x319   : > { %709 = vpow2.f32 %v343_v36 }
 0x31c   : > { %v472_v37 = vpop.xlane.xlu2 %471 }
 0x31d   : > { %v473_v38 = vsub.f32 %v467_v30, %v472_v37 }
 0x31f   : > { %v710_v39 = vpop.eup %709  ;;  %v474_v40 = vmul.f32 1.442695, %v473_v38 }
 0x320   : > { %648 = vmatmul.msk.f32.vlgmr.msrb.gmra.mxu2 %vm276_vm2, %v710_v39  ;;  %v345_v41 = vsel %vm276_vm2, %v710_v39, 0.0 }
 0x321   : > { %711 = vpow2.f32 %v474_v40  ;;  %346 = vadd.xlane.f32.xlu2 %v345_v41 }
 0x324   : > { %v407_v42 = vpop.xlane.xlu2 %406 }
 0x325   : > { %v408_v43 = vsub.f32 %v402_v32, %v407_v42 }
 0x327   : > { %v712_v44 = vpop.eup %711  ;;  %v409_v45 = vmul.f32 1.442695, %v408_v43 }
 0x328   : > { %v476_v46 = vsel %vm276_vm2, %v712_v44, 0.0 }
 0x329   : > { %713 = vpow2.f32 %v409_v45  ;;  %477 = vadd.xlane.f32.xlu2 %v476_v46 }
 0x32c   : > { %v480_v47 = vpop.permute.xlu1 %479 }
 0x32d   : > { %500 = vmatpush.msra.mxu2 %v480_v47 }
 0x32e   : > { %654 = vmatmul.msk.f32.vlgmr.msra.gmra.mxu2 %vm276_vm2, %v712_v44 }
 0x32f   : > { %v714_v48 = vpop.eup %713 }
 0x330   : > { %651 = vmatmul.msk.f32.vlgmr.msra.gmra.mxu1 %vm276_vm2, %v714_v48  ;;  %v411_v49 = vsel %vm276_vm2, %v714_v48, 0.0 }
 0x331   : > { %412 = vadd.xlane.f32.xlu0 %v411_v49  ;;  %284 = vadd.xlane.f32.xlu2 %v283_v50 }
 0x394   : > { %v347_v51 = vpop.xlane.xlu2 %346 }
 0x395   : > { %715 = vrcp.f32 %v347_v51 }
 0x39b   : > { %v716_v52 = vpop.eup %715 }
 0x39c   : > { %v478_v56 = vpop.xlane.xlu2 %477 }
 0x3a3   : > { %v372_v53 = vpop.f32.mrf.mxu2 }
 0x3a4   : > { %v376_v54 = vmul.f32 %v716_v52, %v372_v53  ;;  %v413_v55 = vpop.xlane.xlu0 %412  ;;  %v285_v7 = vpop.xlane.xlu2 %284 }
 0x3a5   : > { %717 = vrcp.f32 %v413_v55 }
 0x3a6   : > { %508 = vrot.lane.b32.xlu1 %v376_v54, %s787_s5  ;;  %719 = vrcp.f32 %v478_v56 }
 0x3a7   : > { %721 = vrcp.f32 %v285_v7 }
 0x3ab   : > { %v718_v57 = vpop.eup %717 }
 0x3ac   : > { %v720_v60 = vpop.eup %719 }
 0x3ad   : > { %v437_v58 = vpop.f32.mrf.mxu1  ;;  %v722_v8 = vpop.eup %721 }
 0x3ae   : > { %v441_v59 = vmul.f32 %v718_v57, %v437_v58  ;;  %v310_v10 = vmul.f32 %v722_v8, %v912_v27 }
 0x3b0   : > { %512 = vrot.lane.b32.xlu2 %v441_v59, %s793_s11  ;;  %s186_s11 = sand.u32 1, %s777_s16  }
 0x3b1   : > { %v502_v61 = vpop.f32.mrf.mxu2  ;;  %s639_s12 = sshll.u32 %s186_s11, 3  ;;  %s561_s5 = scalar_lea.sflag [#allocation3], %s186_s11 }
 0x3b2   : > { %v506_v62 = vmul.f32 %v720_v60, %v502_v61  ;;  %s188_s28 = scalar_lea.vmem [#allocation2], %s639_s12 }
 0x3b3   : > { %s573_s29 = sshll.u32 %s188_s28, 4  ;;  %s574_s29 = int_to_ptr.vmem [resolvable:$true] %s573_s29 }
 0x3b4   : > { %516 = vrot.lane.b32.xlu1 %v506_v62, %s788_s6  ;;  %s739_s6 = scalar_lea.hbm %s738_s19, 8 }
 0x3b5   : > { %p740_p11 = scmp.ne.s32.totalorder %s738_s19, %s739_s6  ;;  %p745_p1 = scmp.lt.s32.totalorder %s743_s9, %s739_s6 }
 0x3b7   : > { %p741_p12 = pnand %p740_p11, %p857_p5  ;;  %p746_p2 = por %p745_p1, %p744_p0 }
 0x3b9   : > { %p742_p13 = pneg %p741_p12 }
 0x3bb   : > { %p747_p3 = pnand %p746_p2, %p742_p13 }
 0x40a   : > { %v513_v12 = vpop.permute.xlu2 %512 }
 0x418   : > { %v509_v9 = vpop.permute.xlu1 %508 }
 0x419   : > { %v519_v11 = vsel %vm250_vm1, %v310_v10, %v509_v9 }
 0x41a   : > { %v520_v13 = vsel %vm202_vm0, %v519_v11, %v513_v12 }
 0x426   : > { %v517_v14 = vpop.permute.xlu1 %516 }
 0x427   : > { %v522_v15 = vsel %vm521_vm3, %v520_v13, %v517_v14 }
 0x428   : > { %655 = vmatmul.msk.f32.vlgmr.msrb.gmra.mxu0 %vm535_vm4, %v522_v15 }
 0x4a5   : > { %v556_v17 = vpop.f32.mrf.mxu0 }
 0x4a6   : > { %v557_v18 = vadd.f32 %v706_v16, %v556_v17 }
 0x4a8   : > { %559 = vst.msk [vmem:[%s188_s28] sm:$0xff] %vm202_vm0, %v557_v18 }
 0x4a9   : > { %750 = shalt.err (!%p747_p3)
}
 0x4aa   : > { %660 = dma.vmem_to_hbm [thread:$0]  (%p857_p5), %s574_s29, 128, %s576_s30, %s561_s5  }
 0x4ab PF: > { %p666_p4 = scmp.ge.s32.totalorder %s785_s18, 2  ;;  %s587_s11 = sand.u32 1, %s773_s15  }
 0x4ac   : > { %s588_s13 = scalar_lea.sflag [#allocation3], %s587_s11 }
 0x4ad   : > { %p663_p7 = pnand %p666_p4, %p861_p6 }
 0x4af   : > { %p664_p8 = pneg %p663_p7 }
 0x4b1   : > { %768 = dma.done.wait (%p664_p8), %s588_s13, 128  }
 0x4b2   : > { %770 = vsyncadd (%p664_p8), %s588_s13, 4294967168  ;;  %p14_p9 = scmp.ge.s32.totalorder %s844_s21, 4   ;;  %s998_s15 = smov %s777_s16 }
 0x4b3   : > { %s999_s16 = smov %s781_s17  ;;  %s1000_s17 = smov %s855_s24 }
 0x4b4   : > { %s1001_s18 = smov %s844_s21  ;;  %16 = sbr.rel (!%p14_p9) target bundleno = 3 (0x3), region = 71 }
 0x4b9   :  { %594 = vsyncpa [#allocation3], 1 }
 0x4ba   :  { %596 = vsyncpa [#allocation3 + $0x1], 1 }

</bundles_post_ra>
